<compile_context>
chip_gen: v5e
topology: v5e:2x2
jax: 0.10.0
libtpu: 0.0.40
codegen_flags: <defaults>
</compile_context>

<pallas_src>
import math

import jax
import jax.numpy as jnp
from jax.experimental import pallas as pl
from jax.experimental.pallas import tpu as pltpu

_LANE = 128
_SUBLANE = 8
_MAX_TILE_ROWS = 8192                   # 4 MiB f32 / 2 MiB bf16 per (TR, 128) tile
_VMEM_BUDGET_BYTES = 32 * 1024 * 1024   # double-buffered pipeline working-set budget
_VMEM_LIMIT_BYTES = 48 * 1024 * 1024    # scoped-VMEM cap (< 64 MiB v7x physical)
_BATCH_IN_BLOCK_MAX_B = 8               # whole batch in one block when B <= this


def make_fixed_positional_encoding(in_channels: int, in_res) -> jnp.ndarray:
    """Mirror of PositionalEncoding._make_fixed_positional_encoding."""
    if isinstance(in_res, int):
        in_res = [in_res]
    l = 1
    for r in in_res:
        l *= int(r)
    position = jnp.arange(0, l, dtype=jnp.float32)[:, None]           # (l, 1)
    two_i = jnp.arange(0, in_channels, 2, dtype=jnp.float32)          # (ceil(C/2),)
    div_term = jnp.exp(two_i * -(math.log(10000.0) / in_channels))    # (ceil(C/2),)
    sin_part = jnp.sin(position * div_term)                           # (l, ceil(C/2))
    cos_part = jnp.cos(position * div_term)                           # (l, ceil(C/2))
    enc = jnp.zeros((l, in_channels), dtype=jnp.float32)
    enc = enc.at[:, 0::2].set(sin_part[:, : (in_channels + 1) // 2])
    enc = enc.at[:, 1::2].set(cos_part[:, : in_channels // 2])        # guard odd C
    # (l, C) -> (C, l) -> (C, *in_res) -> (1, C, *in_res)
    return enc.T.reshape(in_channels, *in_res)[None, ...]


def _add_pos_enc_kernel(x_ref, pe_ref, o_ref):
    # x_ref: (Bblk, TR, 128), pe_ref: (1, TR, 128); jnp broadcasting handles
    # the batch-in-block case.  Pure elementwise add on matching VMEM tiles.
    o_ref[...] = (x_ref[...] + pe_ref[...]).astype(o_ref.dtype)


def _round_down_mult(v: int, m: int) -> int:
    return (v // m) * m


def _round_up_mult(v: int, m: int) -> int:
    return ((v + m - 1) // m) * m


def _choose_tile_rows(R: int, batch_rows_per_block: int, itemsize: int) -> int:
    """Pick TR (rows of 128 lanes per block), multiple of 8 or == R."""
    # Double-buffered working set per row: x tile + out tile (batch_rows each)
    # + pe tile (1 row of batch), all of width 128 lanes.
    per_row = 2 * (2 * batch_rows_per_block + 1) * _LANE * itemsize
    tr = _VMEM_BUDGET_BYTES // per_row
    tr = min(tr, _MAX_TILE_ROWS, R)
    tr = max(_round_down_mult(tr, _SUBLANE), _SUBLANE)
    if tr >= R:
        tr = R
    # If everything fits in one tile, split it so there are >= 2 feature
    # tiles and the "parallel" tile axis can use both v7x TensorCores.
    if tr == R and R >= 2 * _SUBLANE:
        half = _round_up_mult((R + 1) // 2, _SUBLANE)
        if half < R:
            tr = half
    return tr


def _lane_dense_add(x_v: jnp.ndarray, pe_v: jnp.ndarray) -> jnp.ndarray:
    """x_v: (B, R, 128); pe_v: (1, R, 128), same dtype.  Returns x_v + pe_v."""
    B, R, _ = x_v.shape
    itemsize = jnp.dtype(x_v.dtype).itemsize

    if B <= _BATCH_IN_BLOCK_MAX_B:
        # Whole batch in one block: pe is read exactly once per feature tile
        # and the number of grid steps is num_t (not B * num_t).
        TR = _choose_tile_rows(R, B, itemsize)
        num_t = pl.cdiv(R, TR)
        return pl.pallas_call(
            _add_pos_enc_kernel,
            out_shape=jax.ShapeDtypeStruct((B, R, _LANE), x_v.dtype),
            grid_spec=pltpu.PrefetchScalarGridSpec(
                num_scalar_prefetch=0,
                grid=(num_t,),
                in_specs=[
                    pl.BlockSpec((B, TR, _LANE), lambda t: (0, t, 0)),
                    pl.BlockSpec((1, TR, _LANE), lambda t: (0, t, 0)),
                ],
                out_specs=pl.BlockSpec((B, TR, _LANE), lambda t: (0, t, 0)),
            ),
            compiler_params=pltpu.CompilerParams(
                dimension_semantics=("parallel",),
                vmem_limit_bytes=_VMEM_LIMIT_BYTES,
            ),
        )(x_v, pe_v)

    # Large batch: feature-tile axis OUTER, batch INNER.  pe's block index is
    # constant across B consecutive inner steps, so it is fetched once per
    # feature tile (per core) instead of once per step.
    TR = _choose_tile_rows(R, 1, itemsize)
    num_t = pl.cdiv(R, TR)
    return pl.pallas_call(
        _add_pos_enc_kernel,
        out_shape=jax.ShapeDtypeStruct((B, R, _LANE), x_v.dtype),
        grid_spec=pltpu.PrefetchScalarGridSpec(
            num_scalar_prefetch=0,
            grid=(num_t, B),
            in_specs=[
                pl.BlockSpec((1, TR, _LANE), lambda t, b: (b, t, 0)),
                pl.BlockSpec((1, TR, _LANE), lambda t, b: (0, t, 0)),
            ],
            out_specs=pl.BlockSpec((1, TR, _LANE), lambda t, b: (b, t, 0)),
        ),
        compiler_params=pltpu.CompilerParams(
            # Shard the feature-tile axis across v7x cores; keep the batch
            # axis (where pe is reused) sequential within each core.
            dimension_semantics=("parallel", "arbitrary"),
            vmem_limit_bytes=_VMEM_LIMIT_BYTES,
        ),
    )(x_v, pe_v)


def positional_encoding_forward(x: jnp.ndarray, pos_enc: jnp.ndarray) -> jnp.ndarray:
    """x: (B, C, *spatial); pos_enc: (1, C, *spatial).  Returns x + pos_enc."""
    assert pos_enc.shape[0] == 1 and pos_enc.shape[1:] == x.shape[1:], (
        f"pos_enc shape {pos_enc.shape} incompatible with x shape {x.shape}")
    B = x.shape[0]
    N = 1
    for d in x.shape[1:]:
        N *= int(d)

    # Cast pe once to the activation dtype (halves pe HBM bytes for bf16 and
    # keeps the in-kernel store dtype consistent).
    pe = pos_enc.astype(x.dtype)

    # Flatten feature dims and pad the lane dim to a multiple of 128 so every
    # load/store is lane-dense (no masked partial stores, bounded VMEM use).
    x_flat = x.reshape(B, N)
    pe_flat = pe.reshape(1, N)
    n_pad = _round_up_mult(N, _LANE)
    if n_pad != N:
        pad = n_pad - N
        x_flat = jnp.pad(x_flat, ((0, 0), (0, pad)))
        pe_flat = jnp.pad(pe_flat, ((0, 0), (0, pad)))
    R = n_pad // _LANE

    out = _lane_dense_add(x_flat.reshape(B, R, _LANE),
                          pe_flat.reshape(1, R, _LANE))
    out = out.reshape(B, n_pad)
    if n_pad != N:
        out = out[:, :N]
    return out.reshape(x.shape)


if __name__ == "__main__":
    key = jax.random.PRNGKey(0)
    k1, k2 = jax.random.split(key)

    # Primary test: lane-dense path (N divisible by 128).
    B, C, H, W = 2, 4, 16, 16
    x = jax.random.normal(k1, (B, C, H, W), dtype=jnp.float32)
    pos_enc = make_fixed_positional_encoding(C, (H, W))   # (1, C, H, W)
    out = jax.block_until_ready(positional_encoding_forward(x, pos_enc))
    ref = x + pos_enc
    assert out.shape == (B, C, H, W)
    assert jnp.allclose(out, ref, atol=1e-6), "mismatch vs reference (main path)"

    # Secondary test: N not divisible by 128 -> padded lane-dense path.
    B2, C2, H2, W2 = 2, 3, 5, 5
    x2 = jax.random.normal(k2, (B2, C2, H2, W2), dtype=jnp.float32)
    pe2 = make_fixed_positional_encoding(C2, (H2, W2))
    out2 = jax.block_until_ready(positional_encoding_forward(x2, pe2))
    assert jnp.allclose(out2, x2 + pe2, atol=1e-6), "mismatch vs reference (padded path)"

    print("KERNEL_OK")
</pallas_src>

<mosaic_0001>
module attributes {stable_mosaic.version = 11 : i64} {
  func.func @_add_pos_enc_kernel(%arg0: i32, %arg1: memref<2x8x128xf32, #tpu.memory_space<vmem>>, %arg2: memref<1x8x128xf32, #tpu.memory_space<vmem>>, %arg3: memref<2x8x128xf32, #tpu.memory_space<vmem>>) attributes {dimension_semantics = [#tpu.dimension_semantics<parallel>], iteration_bounds = array<i64: 1>, scalar_prefetch = 0 : i64, scratch_operands = 0 : i64, tpu.core_type = #tpu.core_type<tc>, window_params = [{transform_indices = @transform_0, window_bounds = array<i64: 2, 8, 128>}, {transform_indices = @transform_1, window_bounds = array<i64: 1, 8, 128>}, {transform_indices = @transform_2, window_bounds = array<i64: 2, 8, 128>}]} {
    %c0 = arith.constant 0 : index
    %c0_0 = arith.constant 0 : index
    %c0_1 = arith.constant 0 : index
    %0 = vector.load %arg1[%c0, %c0_0, %c0_1] : memref<2x8x128xf32, #tpu.memory_space<vmem>>, vector<2x8x128xf32>
    %c0_2 = arith.constant 0 : index
    %c0_3 = arith.constant 0 : index
    %c0_4 = arith.constant 0 : index
    %1 = vector.load %arg2[%c0_2, %c0_3, %c0_4] : memref<1x8x128xf32, #tpu.memory_space<vmem>>, vector<1x8x128xf32>
    %2 = vector.broadcast %1 : vector<1x8x128xf32> to vector<2x8x128xf32>
    %3 = arith.addf %0, %2 : vector<2x8x128xf32>
    %c0_5 = arith.constant 0 : index
    %c0_6 = arith.constant 0 : index
    %c0_7 = arith.constant 0 : index
    %4 = vector.load %arg3[%c0_5, %c0_6, %c0_7] : memref<2x8x128xf32, #tpu.memory_space<vmem>>, vector<2x8x128xf32>
    tpu.vector_store %arg3[%c0_5, %c0_6, %c0_7], %3 {strides = array<i32>} : memref<2x8x128xf32, #tpu.memory_space<vmem>>, vector<2x8x128xf32>,
    return
  }
  func.func @transform_0(%arg0: i32) -> (i32, i32, i32) {
    %c0_i32 = arith.constant 0 : i32
    %c0_i32_0 = arith.constant 0 : i32
    %c0_i32_1 = arith.constant 0 : i32
    return %c0_i32, %arg0, %c0_i32_0 : i32, i32, i32
  }
  func.func @transform_1(%arg0: i32) -> (i32, i32, i32) {
    %c0_i32 = arith.constant 0 : i32
    %c0_i32_0 = arith.constant 0 : i32
    %c0_i32_1 = arith.constant 0 : i32
    return %c0_i32, %arg0, %c0_i32_0 : i32, i32, i32
  }
  func.func @transform_2(%arg0: i32) -> (i32, i32, i32) {
    %c0_i32 = arith.constant 0 : i32
    %c0_i32_0 = arith.constant 0 : i32
    %c0_i32_1 = arith.constant 0 : i32
    return %c0_i32, %arg0, %c0_i32_0 : i32, i32, i32
  }
}

</mosaic_0001>

<bundles_post_ra>
// kernel: tpu_custom_call.1
= control target key start
LH: loop header
LB: loop body
LE: loop exit
PB: predicated region body
PF: predicated region fallthrough
CT: control target
= control target key end

     0   :  { %7 = vsyncpa [#allocation3], 0  ;;  %s181_s0 = inlined_call_operand.hbm [shape: f32[2,8,128], index: 0, kind: input, shape index: {}]   ;;  %s182_s1 = inlined_call_operand.hbm [shape: f32[1,8,128], index: 1, kind: input, shape index: {}]   ;;  %s183_s2 = inlined_call_operand.hbm [shape: f32[2,8,128], index: 2, kind: output, shape index: {}]  }
   0x1   :  { %8 = vsyncpa [#allocation6], 0 }
   0x2   :  { %9 = vsyncpa [#allocation4], 0  ;;  %s14_s11 = sshll.u32 %s181_s0, 4  ;;  %s152_s12 = smov [#allocation2]   ;;  %s15_s11 = int_to_ptr.hbm [resolvable:$true] %s14_s11 }
   0x3   :  { %s16_s13 = sshll.u32 %s152_s12, 4  ;;  %s28_s16 = sshll.u32 %s182_s1, 4  ;;  %s17_s13 = int_to_ptr.vmem [resolvable:$true] %s16_s13  ;;  %s29_s16 = int_to_ptr.hbm [resolvable:$true] %s28_s16 }
   0x4   :  { %s153_s17 = smov 128   ;;  %s154_s18 = smov 8  }
   0x5   :  { %22 = dma.hbm_to_vmem [thread:$0]  %s15_s11, 256, %s17_s13, [#allocation3], %s153_s17, %s153_s17, %s154_s18  }
   0x6   :  { %s155_s19 = smov [#allocation5]  }
   0x7   :  { %s30_s20 = sshll.u32 %s155_s19, 4  ;;  %s31_s20 = int_to_ptr.vmem [resolvable:$true] %s30_s20 }
   0x8   :  { %33 = dma.hbm_to_vmem [thread:$0]  %s29_s16, 128, %s31_s20, [#allocation6]  }
   0x9   :  { %146 = dma.done.wait [#allocation3], 256  }
   0xa   :  { %147 = vsyncadd [#allocation3], 4294967040 }
   0xb   :  { %148 = dma.done.wait [#allocation6], 128  }
   0xc   :  { %149 = vsyncadd [#allocation6], 4294967168  ;;  %s156_s0 = smov [#allocation7]   ;;  %s55_s24 = sshll.u32 %s183_s2, 4  ;;  %v42_v0 = vld [vmem:[#allocation2] sm:$0xff]  ;;  %v44_v1 = vld [vmem:[#allocation5] sm:$0xff]  ;;  %s56_s24 = int_to_ptr.hbm [resolvable:$true] %s55_s24 }
   0xd   :  { %s53_s21 = sshll.u32 %s156_s0, 4  ;;  %v43_v2 = vld [vmem:[#allocation2 + $0x8] sm:$0xff]  ;;  %v45_v3 = vadd.f32 %v44_v1, %v42_v0  ;;  %s54_s21 = int_to_ptr.vmem [resolvable:$true] %s53_s21 }
   0xe   :  { %v46_v4 = vadd.f32 %v44_v1, %v43_v2 }
   0xf   :  { %47 = vst [vmem:[#allocation7] sm:$0xff] %v45_v3 }
  0x10   :  { %48 = vst [vmem:[#allocation7 + $0x8] sm:$0xff] %v46_v4 }
  0x11   :  { %61 = dma.vmem_to_hbm [thread:$0]  %s54_s21, 256, %s56_s24, [#allocation4], %s153_s17, %s153_s17, %s154_s18  }
  0x12   :  { %150 = dma.done.wait [#allocation4], 256  }
  0x13   :  { %151 = vsyncadd [#allocation4], 4294967040 }
  0x14   :  { %66 = vsyncpa [#allocation3], 1 }
  0x15   :  { %67 = vsyncpa [#allocation6], 1 }
  0x16   :  { %68 = vsyncpa [#allocation4], 1 }

</bundles_post_ra>
